<compile_context>
chip_gen: v5e
topology: v5e:2x2
jax: 0.10.0
libtpu: 0.0.40
codegen_flags: <defaults>
</compile_context>

<pallas_src>
import functools
import math

import jax
import jax.numpy as jnp
from jax import lax
from jax.experimental import pallas as pl
from jax.experimental.pallas import tpu as pltpu


def _round_up(x, m):
    return ((x + m - 1) // m) * m


def _vmem_limit_bytes():
    """Scoped-VMEM budget: ~3/4 of physical capacity (64 MiB on v7x, 128 MiB v5e/v6e)."""
    try:
        cap = pltpu.get_tpu_info().vmem_capacity_bytes
    except Exception:
        cap = 64 * 1024 * 1024  # conservative fallback (v7x-sized)
    return int(min(cap, 128 * 1024 * 1024) * 3 // 4)


# --------------------------------------------------------------------------
# Projection kernel: y = x @ W + b (bf16 operands, f32 accumulation, bf16 out)
# --------------------------------------------------------------------------
def proj_kernel(x_ref, w_ref, b_ref, o_ref):
    y = jnp.dot(x_ref[0], w_ref[...], preferred_element_type=jnp.float32)
    o_ref[0] = (y + b_ref[...]).astype(o_ref.dtype)


def _project(x, w, b, row_tile, vmem_limit):
    """x: (B, Sp, Din) bf16, w: (Din, Dout) bf16, b: (1, Dout) f32 -> (B, Sp, Dout) bf16."""
    B, Sp, Din = x.shape
    Dout = w.shape[1]
    return pl.pallas_call(
        proj_kernel,
        out_shape=jax.ShapeDtypeStruct((B, Sp, Dout), jnp.bfloat16),
        grid=(B, Sp // row_tile),
        in_specs=[
            pl.BlockSpec((1, row_tile, Din), lambda bi, i: (bi, i, 0)),
            # Grid-invariant weights/bias: single-buffered.
            pl.BlockSpec((Din, Dout), lambda bi, i: (0, 0),
                         pipeline_mode=pl.Buffered(1)),
            pl.BlockSpec((1, Dout), lambda bi, i: (0, 0),
                         pipeline_mode=pl.Buffered(1)),
        ],
        out_specs=pl.BlockSpec((1, row_tile, Dout), lambda bi, i: (bi, i, 0)),
        compiler_params=pltpu.CompilerParams(
            dimension_semantics=("parallel", "parallel"),
            vmem_limit_bytes=vmem_limit),
    )(x, w, b)


# --------------------------------------------------------------------------
# Attention + output-projection kernel
# --------------------------------------------------------------------------
def attn_kernel(q_ref, k_ref, v_ref, wo_ref, bo_ref, o_ref, ctx_ref,
                *, num_heads, head_pad, seq_valid, seq_pad):
    """One (batch, q_tile) step.

    q_ref: (1, TQ, H*hp) bf16 (already scaled by 1/sqrt(hd) via Wq/bq folding)
    k_ref, v_ref: (1, Sp, H*hp) bf16 (projected, head-padded)
    wo_ref: (H*hp, Dp) bf16 ; bo_ref: (1, Dp) f32
    o_ref: (1, TQ, Dp) ; ctx_ref: (TQ, H*hp) bf16 VMEM scratch
    """
    qb = q_ref[0]
    kb = k_ref[0]
    vb = v_ref[0]

    # Static key-padding mask (only materialized when the KV length was padded).
    if seq_pad > seq_valid:
        col = lax.broadcasted_iota(jnp.int32, (1, seq_pad), 1)
        key_bias = jnp.where(col < seq_valid, 0.0, -1e30).astype(jnp.float32)
    else:
        key_bias = None

    # Contract the last (head) axes directly -- no explicit transpose.
    dn = (((1,), (1,)), ((), ()))

    for h in range(num_heads):
        lo = h * head_pad          # 128-lane-aligned static offsets: no relayout
        hi = lo + head_pad
        qh = qb[:, lo:hi]          # (TQ, hp) bf16
        kh = kb[:, lo:hi]          # (Sp, hp) bf16
        vh = vb[:, lo:hi]          # (Sp, hp) bf16

        s = lax.dot_general(qh, kh, dn, preferred_element_type=jnp.float32)  # (TQ, Sp)
        if key_bias is not None:
            s = s + key_bias

        # Numerically stable softmax; elementwise math stays in f32 (v5e-safe).
        m = jnp.max(s, axis=-1, keepdims=True)
        p = jnp.exp(s - m)
        denom = jnp.sum(p, axis=-1, keepdims=True)

        # Unnormalized P.V, then normalize the small (TQ, hp) context instead of
        # the (TQ, Sp) probabilities; exact reciprocal is essentially free here.
        ctx = jnp.dot(p.astype(jnp.bfloat16), vh,
                      preferred_element_type=jnp.float32)                    # (TQ, hp)
        ctx_ref[:, lo:hi] = (ctx * pl.reciprocal(denom)).astype(jnp.bfloat16)

    # One deep-K output projection: (TQ, H*hp) @ (H*hp, Dp); padded head rows of
    # Wo are zero, so the result equals concat(ctx_h) @ Wo exactly.
    out = jnp.dot(ctx_ref[...], wo_ref[...], preferred_element_type=jnp.float32)
    o_ref[0] = (out + bo_ref[...]).astype(o_ref.dtype)   # lane-dense (TQ, Dp) store


# --------------------------------------------------------------------------
# Tile pickers
# --------------------------------------------------------------------------
def _pick_row_tile(L):
    if L <= 512:
        return _round_up(max(L, 8), 8)
    return 512


def _pick_q_tile(Lq, skv_pad, dh, d_pad, budget):
    if Lq <= 128:
        return _round_up(max(Lq, 8), 8)
    cap = _round_up(Lq, 128)
    kv_bytes = 2 * (2 * skv_pad * dh * 2)          # K + V blocks, double-buffered bf16
    w_bytes = dh * d_pad * 2 + d_pad * 4           # single-buffered Wo + bo
    for tq in (512, 256, 128):
        if tq > cap:
            continue
        step = (2 * tq * dh * 2                    # q tile (double-buffered bf16)
                + 2 * tq * d_pad * 4               # output tile (double-buffered f32)
                + tq * dh * 2                      # ctx scratch (bf16)
                + 3 * tq * skv_pad * 4)            # f32 score/prob intermediates
        if kv_bytes + w_bytes + step <= budget:
            return tq
    return 128


# --------------------------------------------------------------------------
# Wrapper
# --------------------------------------------------------------------------
def multi_head_attention(q, k, v, params, num_heads):
    """q: (B, Lq, D), k/v: (B, Lkv, D) f32. params: (D, D) weights stored (in, out), (1, D) biases."""
    B, Lq, D = q.shape
    _, Lkv, _ = k.shape
    assert k.shape == v.shape and k.shape[0] == B and k.shape[2] == D
    assert D % num_heads == 0, "d_model must be divisible by num_heads"
    hd = D // num_heads
    hp = _round_up(hd, 128)            # per-head width padded to full lanes
    Dh = num_heads * hp                # head-padded model dim (Q/K/V layout)
    d_pad = _round_up(D, 128)          # lane-dense output model dim
    scale = 1.0 / math.sqrt(hd)

    vmem_limit = _vmem_limit_bytes()
    budget = int(vmem_limit * 0.8)

    # ---- wrapper-side layout plumbing (static zero padding / reordering) ----
    def pad_seq_cols(x, s_pad):
        return jnp.pad(x, ((0, 0), (0, s_pad - x.shape[1]), (0, d_pad - D)))

    def head_pad_w(w):                 # (D, D) -> (d_pad, Dh): per-head column padding
        w = jnp.pad(w, ((0, d_pad - D), (0, 0)))
        w = w.reshape(d_pad, num_heads, hd)
        w = jnp.pad(w, ((0, 0), (0, 0), (0, hp - hd)))
        return w.reshape(d_pad, Dh)

    def head_pad_b(b):                 # (1, D) -> (1, Dh)
        b = b.reshape(1, num_heads, hd)
        b = jnp.pad(b, ((0, 0), (0, 0), (0, hp - hd)))
        return b.reshape(1, Dh)

    def head_pad_wo(w):                # (D, D) -> (Dh, d_pad): per-head row padding
        w = jnp.pad(w, ((0, 0), (0, d_pad - D)))
        w = w.reshape(num_heads, hd, d_pad)
        w = jnp.pad(w, ((0, 0), (0, hp - hd), (0, 0)))
        return w.reshape(Dh, d_pad)

    # Fold the 1/sqrt(head_dim) score scale into the Q projection (exact).
    wq = head_pad_w(params["wq"] * scale).astype(jnp.bfloat16)
    bq = head_pad_b(params["bq"] * scale).astype(jnp.float32)
    wk = head_pad_w(params["wk"]).astype(jnp.bfloat16)
    bk = head_pad_b(params["bk"]).astype(jnp.float32)
    wv = head_pad_w(params["wv"]).astype(jnp.bfloat16)
    bv = head_pad_b(params["bv"]).astype(jnp.float32)
    wo = head_pad_wo(params["wo"]).astype(jnp.bfloat16)
    bo = jnp.pad(params["bo"], ((0, 0), (0, d_pad - D))).astype(jnp.float32)

    # Row tiles + sequence padding (padded keys are masked inside the kernel).
    tkv = _pick_row_tile(Lkv)
    Skv = _round_up(Lkv, tkv)
    tq = _pick_q_tile(Lq, Skv, Dh, d_pad, budget)
    Sq = _round_up(Lq, tq)

    xq = pad_seq_cols(q, Sq).astype(jnp.bfloat16)
    xk = pad_seq_cols(k, Skv).astype(jnp.bfloat16)
    xv = pad_seq_cols(v, Skv).astype(jnp.bfloat16)

    # ---- projection pass (hoisted: K/V projected once, not once per q-tile) ----
    qp = _project(xq, wq, bq, tq, vmem_limit)     # (B, Sq,  Dh) bf16, pre-scaled
    kp = _project(xk, wk, bk, tkv, vmem_limit)    # (B, Skv, Dh) bf16
    vp = _project(xv, wv, bv, tkv, vmem_limit)    # (B, Skv, Dh) bf16

    # ---- attention + output projection ----
    kernel = functools.partial(attn_kernel, num_heads=num_heads, head_pad=hp,
                               seq_valid=Lkv, seq_pad=Skv)
    out = pl.pallas_call(
        kernel,
        out_shape=jax.ShapeDtypeStruct((B, Sq, d_pad), q.dtype),
        grid=(B, Sq // tq),
        in_specs=[
            pl.BlockSpec((1, tq, Dh), lambda b, i: (b, i, 0)),
            pl.BlockSpec((1, Skv, Dh), lambda b, i: (b, 0, 0)),
            pl.BlockSpec((1, Skv, Dh), lambda b, i: (b, 0, 0)),
            # Grid-invariant output-projection weights/bias: single-buffered.
            pl.BlockSpec((Dh, d_pad), lambda b, i: (0, 0),
                         pipeline_mode=pl.Buffered(1)),
            pl.BlockSpec((1, d_pad), lambda b, i: (0, 0),
                         pipeline_mode=pl.Buffered(1)),
        ],
        out_specs=pl.BlockSpec((1, tq, d_pad), lambda b, i: (b, i, 0)),
        scratch_shapes=[pltpu.VMEM((tq, Dh), jnp.bfloat16)],
        compiler_params=pltpu.CompilerParams(
            dimension_semantics=("parallel", "parallel"),
            vmem_limit_bytes=vmem_limit),
    )(qp, kp, vp, wo, bo)

    return out[:, :Lq, :D]


# --------------------------------------------------------------------------
# Pure-JAX reference & synthetic params
# --------------------------------------------------------------------------
def mha_reference(q, k, v, params, num_heads):
    """Pure-JAX f32 reference mirroring the PyTorch forward (mask=None)."""
    B, S, D = q.shape
    hd = D // num_heads

    def proj(x, w, b):
        return x @ w + b  # w stored (in, out) = W_pytorch.T

    Q = proj(q, params["wq"], params["bq"]).reshape(B, S, num_heads, hd).transpose(0, 2, 1, 3)
    K = proj(k, params["wk"], params["bk"]).reshape(B, -1, num_heads, hd).transpose(0, 2, 1, 3)
    V = proj(v, params["wv"], params["bv"]).reshape(B, -1, num_heads, hd).transpose(0, 2, 1, 3)

    scores = jnp.einsum("bhqd,bhkd->bhqk", Q, K) / math.sqrt(hd)
    attn = jax.nn.softmax(scores, axis=-1)
    out = jnp.einsum("bhqk,bhkd->bhqd", attn, V)
    out = out.transpose(0, 2, 1, 3).reshape(B, S, D)
    return out @ params["wo"] + params["bo"]


def init_params(key, d_model):
    """Deterministic synthetic init. Weights stored as (in, out) = W_pytorch.T."""
    keys = jax.random.split(key, 8)
    bound = 1.0 / math.sqrt(d_model)  # matches nn.Linear's default init range

    def w(kk):
        return jax.random.uniform(kk, (d_model, d_model), jnp.float32, -bound, bound)

    def b(kk):
        return jax.random.uniform(kk, (1, d_model), jnp.float32, -bound, bound)

    return {
        "wq": w(keys[0]), "bq": b(keys[1]),
        "wk": w(keys[2]), "bk": b(keys[3]),
        "wv": w(keys[4]), "bv": b(keys[5]),
        "wo": w(keys[6]), "bo": b(keys[7]),
    }


if __name__ == "__main__":
    B, S, D, H = 2, 8, 32, 4

    key = jax.random.PRNGKey(0)
    k_params, k_q, k_k, k_v = jax.random.split(key, 4)

    params = init_params(k_params, D)
    q = jax.random.normal(k_q, (B, S, D), jnp.float32)
    k = jax.random.normal(k_k, (B, S, D), jnp.float32)
    v = jax.random.normal(k_v, (B, S, D), jnp.float32)

    out = multi_head_attention(q, k, v, params, H)
    out = jax.block_until_ready(out)

    ref = mha_reference(q, k, v, params, H)
    assert out.shape == (B, S, D)
    # Tolerance loosened vs pure f32: matmul operands are bf16 (f32 accumulation).
    err = float(jnp.max(jnp.abs(out - ref)))
    assert jnp.allclose(out, ref, atol=5e-2, rtol=5e-2), f"max abs err = {err}"

    print("KERNEL_OK")
</pallas_src>

<mosaic_0001>
module attributes {stable_mosaic.version = 11 : i64} {
  func.func @proj_kernel(%arg0: i32, %arg1: i32, %arg2: memref<1x8x128xbf16, #tpu.memory_space<vmem>>, %arg3: memref<128x512xbf16, #tpu.memory_space<vmem>>, %arg4: memref<1x512xf32, #tpu.memory_space<vmem>>, %arg5: memref<1x8x512xbf16, #tpu.memory_space<vmem>>) attributes {dimension_semantics = [#tpu.dimension_semantics<parallel>, #tpu.dimension_semantics<parallel>], iteration_bounds = array<i64: 2, 1>, scalar_prefetch = 0 : i64, scratch_operands = 0 : i64, tpu.core_type = #tpu.core_type<tc>, window_params = [{transform_indices = @transform_0, window_bounds = array<i64: 1, 8, 128>}, {pipeline_mode = #tpu.pipeline_mode<synchronous>, transform_indices = @transform_1, window_bounds = array<i64: 128, 512>}, {pipeline_mode = #tpu.pipeline_mode<synchronous>, transform_indices = @transform_2, window_bounds = array<i64: 1, 512>}, {transform_indices = @transform_3, window_bounds = array<i64: 1, 8, 512>}]} {
    %c0 = arith.constant 0 : index
    %c0_0 = arith.constant 0 : index
    %c0_1 = arith.constant 0 : index
    %0 = vector.load %arg2[%c0, %c0_0, %c0_1] : memref<1x8x128xbf16, #tpu.memory_space<vmem>>, vector<1x8x128xbf16>
    %1 = vector.shape_cast %0 : vector<1x8x128xbf16> to vector<8x128xbf16>
    %c0_2 = arith.constant 0 : index
    %c0_3 = arith.constant 0 : index
    %2 = vector.load %arg3[%c0_2, %c0_3] : memref<128x512xbf16, #tpu.memory_space<vmem>>, vector<128x512xbf16>
    %cst = arith.constant dense<0.000000e+00> : vector<8x512xf32>
    %3 = tpu.matmul %1, %2, %cst {dimension_numbers = #tpu.dot_dimension_numbers<[1], [0], [0], [1], [0, 0, 1, 1], [], []>} : vector<8x128xbf16>, vector<128x512xbf16>, vector<8x512xf32> -> vector<8x512xf32>
    %c0_4 = arith.constant 0 : index
    %c0_5 = arith.constant 0 : index
    %4 = vector.load %arg4[%c0_4, %c0_5] : memref<1x512xf32, #tpu.memory_space<vmem>>, vector<1x512xf32>
    %5 = vector.broadcast %4 : vector<1x512xf32> to vector<8x512xf32>
    %6 = arith.addf %3, %5 : vector<8x512xf32>
    %7 = arith.truncf %6 : vector<8x512xf32> to vector<8x512xbf16>
    %c0_6 = arith.constant 0 : index
    %c0_7 = arith.constant 0 : index
    %c0_8 = arith.constant 0 : index
    %8 = vector.load %arg5[%c0_6, %c0_7, %c0_8] : memref<1x8x512xbf16, #tpu.memory_space<vmem>>, vector<1x8x512xbf16>
    %9 = vector.shape_cast %8 : vector<1x8x512xbf16> to vector<8x512xbf16>
    %10 = vector.shape_cast %7 : vector<8x512xbf16> to vector<1x8x512xbf16>
    tpu.vector_store %arg5[%c0_6, %c0_7, %c0_8], %10 {strides = array<i32>} : memref<1x8x512xbf16, #tpu.memory_space<vmem>>, vector<1x8x512xbf16>,
    return
  }
  func.func @transform_0(%arg0: i32, %arg1: i32) -> (i32, i32, i32) {
    %c0_i32 = arith.constant 0 : i32
    %c0_i32_0 = arith.constant 0 : i32
    return %arg0, %arg1, %c0_i32 : i32, i32, i32
  }
  func.func @transform_1(%arg0: i32, %arg1: i32) -> (i32, i32) {
    %c0_i32 = arith.constant 0 : i32
    %c0_i32_0 = arith.constant 0 : i32
    %c0_i32_1 = arith.constant 0 : i32
    return %c0_i32, %c0_i32_0 : i32, i32
  }
  func.func @transform_2(%arg0: i32, %arg1: i32) -> (i32, i32) {
    %c0_i32 = arith.constant 0 : i32
    %c0_i32_0 = arith.constant 0 : i32
    %c0_i32_1 = arith.constant 0 : i32
    return %c0_i32, %c0_i32_0 : i32, i32
  }
  func.func @transform_3(%arg0: i32, %arg1: i32) -> (i32, i32, i32) {
    %c0_i32 = arith.constant 0 : i32
    %c0_i32_0 = arith.constant 0 : i32
    return %arg0, %arg1, %c0_i32 : i32, i32, i32
  }
}

</mosaic_0001>

<bundles_post_ra>
// kernel: tpu_custom_call.1
= control target key start
LH: loop header
LB: loop body
LE: loop exit
PB: predicated region body
PF: predicated region fallthrough
CT: control target
= control target key end

     0   :  { %8 = vsyncpa [#allocation3], 0  ;;  %s1229_s0 = inlined_call_operand.hbm [shape: bf16[2,8,128], index: 0, kind: input, shape index: {}]   ;;  %s1230_s1 = inlined_call_operand.hbm [shape: bf16[128,512], index: 1, kind: input, shape index: {}]   ;;  %s1231_s2 = inlined_call_operand.hbm [shape: f32[1,512], index: 2, kind: input, shape index: {}]   ;;  %s1232_s3 = inlined_call_operand.hbm [shape: bf16[2,8,512], index: 3, kind: output, shape index: {}]  }
   0x1   :  { %10 = vsyncpa [#allocation3 + $0x1], 0 }
   0x2   :  { %11 = vsyncpa [#allocation6], 0 }
   0x3   :  { %12 = vsyncpa [#allocation4], 0 }
   0x4   :  { %14 = vsyncpa [#allocation4 + $0x1], 0  ;;  %s1081_s12 = smov 0   ;;  %s1083_s13 = smov 0  }
   0x5   :  { %s1085_s14 = smov 0   ;;  %s1087_s15 = smov 0  }
   0x6   :  { %s1089_s16 = smov 0   ;;  %s1091_s17 = smov 0  }
   0x7 LB: > { %s615_s18 = sadd.s32 4294967295, %s1055_s17   ;;  %p617_p0 = scmp.ge.s32.totalorder %s1055_s17, 1  ;;  %s1055_s17 = sphi %s1091_s17, %s20_s17   ;;  %s1051_s16 = sphi %s1089_s16, %s1242_s16   ;;  %s1047_s15 = sphi %s1087_s15, %s1241_s15   ;;  %s1043_s14 = sphi %s1085_s14, %s1240_s14   ;;  %s1039_s13 = sphi %s1083_s13, %s1239_s13   ;;  %s1035_s12 = sphi %s1081_s12, %s1238_s12  }
   0x8   : > { %p1115_p1 = scmp.eq.s32.totalorder %s615_s18, 0  ;;  %p135_p2 = scmp.lt.s32.totalorder %s1055_s17, 3 }
   0x9   : > { %s146_s22 = sshll.u32 %s1230_s1, 4  ;;  %s1057_s24 = smov [#allocation5]   ;;  %s147_s22 = int_to_ptr.hbm [resolvable:$true] %s146_s22 }
   0xa   : > { %p1123_p3 = pnand %p617_p0, %p135_p2  ;;  %s148_s25 = sshll.u32 %s1057_s24, 4  ;;  %s149_s25 = int_to_ptr.vmem [resolvable:$true] %s148_s25 }
   0xb   : > { %p620_p6 = scmp.ge.s32.totalorder %s1055_s17, 2  ;;  %s161_s28 = sshll.u32 %s1231_s2, 4  ;;  %s162_s28 = int_to_ptr.hbm [resolvable:$true] %s161_s28 }
   0xc   : > { %p806_p4 = pneg %p1123_p3  ;;  %s1058_s29 = smov 256  }
   0xd   : > { %s1059_s30 = smov 16   ;;  %s1060_s4 = smov [#allocation7]  }
   0xe   : > { %p807_p5 = pnand %p806_p4, %p1115_p1  ;;  %s163_s5 = sshll.u32 %s1060_s4, 4  ;;  %s164_s5 = int_to_ptr.vmem [resolvable:$true] %s163_s5 }
   0xf   : > { %s32_s6 = sadd.s32 1, %s1051_s16  ;;  %s616_s7 = sadd.s32 4294967294, %s1055_s17  }
  0x10   : > { %809 = dma.hbm_to_vmem [thread:$0]  (!%p807_p5), %s147_s22, 4096, %s149_s25, [#allocation6], %s1058_s29, %s1058_s29, %s1059_s30  }
  0x11   : > { %812 = dma.hbm_to_vmem [thread:$0]  (!%p807_p5), %s162_s28, 64, %s164_s5, [#allocation6]  }
  0x12   : > { %p34_p7 = scmp.ge.s32.totalorder %s32_s6, 2  ;;  %s41_s8 = sadd.s32 1, %s1043_s14 }
  0x13   : > { %p48_p8 = scmp.ne.s32.totalorder %s1043_s14, %s1039_s13  ;;  %p49_p9 = scmp.eq.s32.totalorder %s1055_s17, 0 }
  0x14   : > { %s1244_s6 = smov (%p34_p7, %s32_s6), 0  ;;  %p54_p10 = scmp.ne.s32.totalorder %s1039_s13, %s1035_s12 }
  0x15   : > { %s36_s9 = ssub.s32 %s1051_s16, %s1244_s6  ;;  %p122_p11 = scmp.eq.s32.totalorder %s615_s18, 1 }
  0x16   : > { %p39_p12 = scmp.eq.s32.totalorder %s36_s9, 0  ;;  %p1151_p13 = por %p1115_p1, %p54_p10 }
  0x17   : > { %p1155_p0 = por %p122_p11, %p48_p8  ;;  %p128_p2 = scmp.eq.s32.totalorder %s616_s7, 1 }
  0x18   : > { %s1160_s20 = scalar_select %p39_p12, %s1043_s14, %s41_s8  }
  0x19   : > { %p50_p4 = por %p49_p9, %p48_p8  ;;  %p1162_p5 = por %p128_p2, %p54_p10 }
  0x1a   : > { %s174_s22 = sand.u32 1, %s1043_s14   ;;  %s622_s18 = sshll.u32 %s1051_s16, 2 }
  0x1b   : > { %p823_p7 = scmp.lt.s32.totalorder %s1055_s17, 2  ;;  %s621_s24 = sshll.u32 %s174_s22, 2 }
  0x1c   : > { %s183_s27 = scalar_lea.hbm %s1229_s0, %s622_s18  ;;  %s178_s29 = scalar_lea.vmem [#allocation2], %s621_s24 }
  0x1d   : > { %s185_s28 = sshll.u32 %s183_s27, 4  ;;  %s187_s30 = sshll.u32 %s178_s29, 4  ;;  %s186_s28 = int_to_ptr.hbm [resolvable:$true] %s185_s28  ;;  %s188_s30 = int_to_ptr.vmem [resolvable:$true] %s187_s30 }
  0x1e   : > { %p814_p11 = pnand %p823_p7, %p50_p4  ;;  %s175_s4 = scalar_lea.sflag [#allocation3], %s174_s22 }
  0x1f   : > { %196 = sbr.rel (%p1123_p3) target bundleno = 215 (0xd7), region = 32  ;;  %s1175_s5 = sand.u32 (!%p1123_p3), 1, %s1039_s13  }
  0x20   : > { %816 = dma.hbm_to_vmem [thread:$0]  (!%p814_p11), %s186_s28, 64, %s188_s30, %s175_s4  }
  0x21   : > { %s624_s7 = sshll.u32 (!%p1123_p3), %s1175_s5, 2  ;;  %s199_s8 = scalar_lea.sflag (!%p1123_p3), [#allocation3], %s1175_s5 }
  0x22   : > { %s1179_s9 = scalar_lea.vmem (!%p1123_p3), [#allocation2], %s624_s7 }
  0x24   : > { %1022 = dma.done.wait (%p1151_p13), %s199_s8, 64  }
  0x25   : > { %1024 = vsyncadd (%p1151_p13), %s199_s8, 4294967232 }
  0x26   : > { %1026 = dma.done.wait (%p1115_p1), [#allocation6], 4160  }
  0x27   : > { %1028 = vsyncadd (%p1115_p1), [#allocation6], 4294963136  ;;  %v742_v0 = vld [vmem:[#allocation5 + $0xe0] sm:$0xf]  ;;  %v791_v1 = vld [vmem:[#allocation5 + $0xec] sm:$0xf0] }
  0x28   : > { %v789_v2 = vld [vmem:[#allocation5 + $0xe4] sm:$0xf]  ;;  %v743_v3 = vor.u32 %v791_v1, %v742_v0  ;;  %v744_v4 = vld [vmem:[#allocation5 + $0xf0] sm:$0xf0]  ;;  %v750_v5 = vld [vmem:[#allocation5 + $0xe8] sm:$0xf] }
  0x29   : > { %v792_v6 = vld [vmem:[#allocation5 + $0xf4] sm:$0xf0]  ;;  %v747_v7 = vor.u32 %v789_v2, %v744_v4  ;;  %v790_v9 = vld [vmem:[#allocation5 + $0xec] sm:$0xf]  ;;  %v752_v10 = vld [vmem:[#allocation5 + $0xf8] sm:$0xf0] }
  0x2a   : > { %v751_v8 = vor.u32 %v792_v6, %v750_v5  ;;  %v726_v11 = vld [vmem:[#allocation5 + $0xc0] sm:$0xf]  ;;  %439 = vmatpush.bf16.msra.mxu0 %v743_v3  ;;  %v755_v12 = vor.u32 %v790_v9, %v752_v10  ;;  %v787_v13 = vld [vmem:[#allocation5 + $0xcc] sm:$0xf0]  ;;  %v785_v14 = vld [vmem:[#allocation5 + $0xc4] sm:$0xf] }
  0x2b   : > { %v728_v15 = vld [vmem:[#allocation5 + $0xd0] sm:$0xf0]  ;;  %452 = vmatpush.bf16.msra.mxu1 %v747_v7  ;;  %v727_v16 = vor.u32 %v787_v13, %v726_v11  ;;  %v734_v18 = vld [vmem:[#allocation5 + $0xc8] sm:$0xf]  ;;  %v788_v19 = vld [vmem:[#allocation5 + $0xd4] sm:$0xf0] }
  0x2c   : > { %465 = vmatpush.bf16.msra.mxu2 %v751_v8  ;;  %v731_v17 = vor.u32 %v785_v14, %v728_v15  ;;  %v786_v20 = vld [vmem:[#allocation5 + $0xcc] sm:$0xf]  ;;  %478 = vmatpush.bf16.msra.mxu3 %v755_v12  ;;  %v735_v21 = vor.u32 %v788_v19, %v734_v18  ;;  %v736_v22 = vld [vmem:[#allocation5 + $0xd8] sm:$0xf0]  ;;  %v710_v23 = vld [vmem:[#allocation5 + $0xa0] sm:$0xf] }
  0x2d   : > { %v783_v24 = vld [vmem:[#allocation5 + $0xac] sm:$0xf0]  ;;  %v739_v25 = vor.u32 %v786_v20, %v736_v22  ;;  %v781_v26 = vld [vmem:[#allocation5 + $0xa4] sm:$0xf]  ;;  %v712_v27 = vld [vmem:[#allocation5 + $0xb0] sm:$0xf0] }
  0x2e   : > { %v718_v28 = vld [vmem:[#allocation5 + $0xa8] sm:$0xf]  ;;  %440 = vmatpush.bf16.msra.mxu0 %v727_v16  ;;  %v711_v29 = vor.u32 %v783_v24, %v710_v23  ;;  %v784_v30 = vld [vmem:[#allocation5 + $0xb4] sm:$0xf0]  ;;  %v782_v31 = vld [vmem:[#allocation5 + $0xac] sm:$0xf]  ;;  %v715_v33 = vor.u32 %v781_v26, %v712_v27 }
  0x2f   : > { %v720_v32 = vld [vmem:[#allocation5 + $0xb8] sm:$0xf0]  ;;  %453 = vmatpush.bf16.msra.mxu1 %v731_v17  ;;  %v719_v34 = vor.u32 %v784_v30, %v718_v28  ;;  %v694_v35 = vld [vmem:[#allocation5 + $0x80] sm:$0xf]  ;;  %v779_v36 = vld [vmem:[#allocation5 + $0x8c] sm:$0xf0] }
  0x30   : > { %466 = vmatpush.bf16.msra.mxu2 %v735_v21  ;;  %v777_v37 = vld [vmem:[#allocation5 + $0x84] sm:$0xf]  ;;  %479 = vmatpush.bf16.msra.mxu3 %v739_v25  ;;  %v723_v38 = vor.u32 %v782_v31, %v720_v32  ;;  %v696_v39 = vld [vmem:[#allocation5 + $0x90] sm:$0xf0]  ;;  %v702_v40 = vld [vmem:[#allocation5 + $0x88] sm:$0xf]  ;;  %v695_v44 = vor.u32 %v779_v36, %v694_v35 }
  0x31   : > { %v780_v41 = vld [vmem:[#allocation5 + $0x94] sm:$0xf0]  ;;  %v778_v42 = vld [vmem:[#allocation5 + $0x8c] sm:$0xf]  ;;  %v704_v43 = vld [vmem:[#allocation5 + $0x98] sm:$0xf0]  ;;  %v699_v45 = vor.u32 %v777_v37, %v696_v39 }
  0x32   : > { %441 = vmatpush.bf16.msra.mxu0 %v711_v29  ;;  %v703_v46 = vor.u32 %v780_v41, %v702_v40  ;;  %v678_v47 = vld [vmem:[#allocation5 + $0x60] sm:$0xf]  ;;  %v775_v48 = vld [vmem:[#allocation5 + $0x6c] sm:$0xf0]  ;;  %v773_v49 = vld [vmem:[#allocation5 + $0x64] sm:$0xf]  ;;  %v707_v50 = vor.u32 %v778_v42, %v704_v43 }
  0x33   : > { %454 = vmatpush.bf16.msra.mxu1 %v715_v33  ;;  %v680_v51 = vld [vmem:[#allocation5 + $0x70] sm:$0xf0]  ;;  %v686_v52 = vld [vmem:[#allocation5 + $0x68] sm:$0xf]  ;;  %v776_v53 = vld [vmem:[#allocation5 + $0x74] sm:$0xf0]  ;;  %v679_v56 = vor.u32 %v775_v48, %v678_v47 }
  0x34   : > { %467 = vmatpush.bf16.msra.mxu2 %v719_v34  ;;  %480 = vmatpush.bf16.msra.mxu3 %v723_v38  ;;  %v774_v54 = vld [vmem:[#allocation5 + $0x6c] sm:$0xf]  ;;  %v688_v55 = vld [vmem:[#allocation5 + $0x78] sm:$0xf0]  ;;  %v683_v57 = vor.u32 %v773_v49, %v680_v51  ;;  %v687_v58 = vor.u32 %v776_v53, %v686_v52  ;;  %v662_v59 = vld [vmem:[#allocation5 + $0x40] sm:$0xf] }
  0x35   : > { %v771_v60 = vld [vmem:[#allocation5 + $0x4c] sm:$0xf0]  ;;  %v769_v61 = vld [vmem:[#allocation5 + $0x44] sm:$0xf]  ;;  %v691_v62 = vor.u32 %v774_v54, %v688_v55  ;;  %v664_v63 = vld [vmem:[#allocation5 + $0x50] sm:$0xf0] }
  0x36   : > { %442 = vmatpush.bf16.msra.mxu0 %v695_v44  ;;  %v670_v0 = vld [vmem:[#allocation5 + $0x48] sm:$0xf]  ;;  %v772_v1 = vld [vmem:[#allocation5 + $0x54] sm:$0xf0]  ;;  %v770_v2 = vld [vmem:[#allocation5 + $0x4c] sm:$0xf]  ;;  %v663_v4 = vor.u32 %v771_v60, %v662_v59  ;;  %v667_v5 = vor.u32 %v769_v61, %v664_v63 }
  0x37   : > { %455 = vmatpush.bf16.msra.mxu1 %v699_v45  ;;  %v672_v3 = vld [vmem:[#allocation5 + $0x58] sm:$0xf0]  ;;  %v671_v6 = vor.u32 %v772_v1, %v670_v0  ;;  %v646_v7 = vld [vmem:[#allocation5 + $0x20] sm:$0xf]  ;;  %v767_v8 = vld [vmem:[#allocation5 + $0x2c] sm:$0xf0] }
  0x38   : > { %468 = vmatpush.bf16.msra.mxu2 %v703_v46  ;;  %481 = vmatpush.bf16.msra.mxu3 %v707_v50  ;;  %v765_v9 = vld [vmem:[#allocation5 + $0x24] sm:$0xf]  ;;  %v675_v10 = vor.u32 %v770_v2, %v672_v3  ;;  %v648_v11 = vld [vmem:[#allocation5 + $0x30] sm:$0xf0]  ;;  %v654_v12 = vld [vmem:[#allocation5 + $0x28] sm:$0xf]  ;;  %v647_v16 = vor.u32 %v767_v8, %v646_v7 }
  0x39   : > { %v768_v13 = vld [vmem:[#allocation5 + $0x34] sm:$0xf0]  ;;  %v766_v14 = vld [vmem:[#allocation5 + $0x2c] sm:$0xf]  ;;  %v656_v15 = vld [vmem:[#allocation5 + $0x38] sm:$0xf0]  ;;  %v651_v17 = vor.u32 %v765_v9, %v648_v11 }
  0x3a   : > { %443 = vmatpush.bf16.msra.mxu0 %v679_v56  ;;  %v655_v18 = vor.u32 %v768_v13, %v654_v12  ;;  %v630_v19 = vld [vmem:[#allocation5] sm:$0xf]  ;;  %v763_v20 = vld [vmem:[#allocation5 + $0xc] sm:$0xf0]  ;;  %v761_v21 = vld [vmem:[#allocation5 + $0x4] sm:$0xf]  ;;  %v659_v22 = vor.u32 %v766_v14, %v656_v15 }
  0x3b   : > { %456 = vmatpush.bf16.msra.mxu1 %v683_v57  ;;  %v632_v23 = vld [vmem:[#allocation5 + $0x10] sm:$0xf0]  ;;  %v638_v24 = vld [vmem:[#allocation5 + $0x8] sm:$0xf]  ;;  %v764_v25 = vld [vmem:[#allocation5 + $0x14] sm:$0xf0]  ;;  %v631_v28 = vor.u32 %v763_v20, %v630_v19 }
  0x3c   : > { %469 = vmatpush.bf16.msra.mxu2 %v687_v58  ;;  %482 = vmatpush.bf16.msra.mxu3 %v691_v62  ;;  %v762_v26 = vld [vmem:[#allocation5 + $0xc] sm:$0xf]  ;;  %v640_v27 = vld [vmem:[#allocation5 + $0x18] sm:$0xf0]  ;;  %v635_v29 = vor.u32 %v761_v21, %v632_v23  ;;  %v639_v30 = vor.u32 %v764_v25, %v638_v24  ;;  %v269_v33 = vld [vmem:[#allocation7] sm:$0xf] }
  0x3d   : > { %v643_v31 = vor.u32 %v762_v26, %v640_v27  ;;  %v236_v32 = vld [vmem:[%s1179_s9] sm:$0xf]  ;;  %v271_v34 = vperm.slane %v269_v33, 0  ;;  %v272_v35 = vperm.slane %v269_v33, 1  ;;  %s627_s19 = sshll.u32 %s1175_s5, 4  ;;  %s793_s23 = sshll.u32 %s1047_s15, 4 }
  0x3e   : > { %444 = vmatpush.bf16.msra.mxu0 %v663_v4  ;;  %v273_v41 = vperm.slane %v269_v33, 2  ;;  %v274_v42 = vperm.slane %v269_v33, 3  ;;  %s509_s18 = scalar_lea.hbm %s1232_s3, %s793_s23  ;;  %s235_s24 = scalar_lea.vmem [#allocation8], %s627_s19 }
  0x3f   : > { %457 = vmatpush.bf16.msra.mxu1 %v667_v5  ;;  %s511_s25 = sshll.u32 %s235_s24, 4  ;;  %s513_s26 = sshll.u32 %s509_s18, 4  ;;  %s512_s25 = int_to_ptr.vmem [resolvable:$true] %s511_s25  ;;  %s514_s26 = int_to_ptr.hbm [resolvable:$true] %s513_s26 }
  0x40   : > { %470 = vmatpush.bf16.msra.mxu2 %v671_v6  ;;  %483 = vmatpush.bf16.msra.mxu3 %v675_v10  ;;  %s496_s15 = scalar_lea.sflag [#allocation4], %s1175_s5  ;;  %s983_s27 = sshra.s32 %s514_s26, 4  ;;  %s984_s27 = int_to_ptr.hbm [resolvable:$true] %s983_s27 }
  0x41   : > { %s985_s28 = scalar_lea.hbm %s984_s27, 16  ;;  %s989_s4 = scalar_lea.hbm %s1232_s3, 32 }
  0x42   : > { %445 = vmatpush.bf16.msra.mxu0 %v647_v16  ;;  %p986_p1 = scmp.ne.s32.totalorder %s984_s27, %s985_s28  ;;  %p990_p9 = scmp.lt.s32.totalorder %s984_s27, %s1232_s3 }
  0x43   : > { %458 = vmatpush.bf16.msra.mxu1 %v651_v17  ;;  %p991_p10 = scmp.lt.s32.totalorder %s989_s4, %s985_s28 }
  0x44   : > { %471 = vmatpush.bf16.msra.mxu2 %v655_v18  ;;  %484 = vmatpush.bf16.msra.mxu3 %v659_v22  ;;  %p987_p3 = pnand %p986_p1, %p1155_p0 }
  0x45   : > { %p992_p12 = por %p991_p10, %p990_p9 }
  0x46   : > { %446 = vmatpush.bf16.msra.mxu0 %v631_v28  ;;  %p988_p8 = pneg %p987_p3 }
  0x47   : > { %459 = vmatpush.bf16.msra.mxu1 %v635_v29 }
  0x48   : > { %472 = vmatpush.bf16.msra.mxu2 %v639_v30  ;;  %485 = vmatpush.bf16.msra.mxu3 %v643_v31  ;;  %p993_p13 = pnand %p992_p12, %p988_p8 }
  0x49   : > { %447 = vmatmul.bf16.vlgmr.msra.gmra.mxu0 %v236_v32 }
  0x4a   : > { %460 = vmatmul.bf16.vlgmr.msra.gmra.mxu1 %v236_v32 }
  0x4b   : > { %473 = vmatmul.bf16.vlgmr.msra.gmra.mxu2 %v236_v32  ;;  %486 = vmatmul.bf16.vlgmr.msra.gmra.mxu3 %v236_v32 }
  0xc6   : > { %v448_v36 = vpop.f32.mrf.mxu0 }
  0xc7   : > { %v449_v37 = vadd.f32 %v448_v36, %v271_v34  ;;  %v461_v38 = vpop.f32.mrf.mxu1 }
  0xc8   : > { %v462_v39 = vadd.f32 %v461_v38, %v272_v35 }
  0xca   : > { %v491_v40 = vpack.c.bf16 %v462_v39, %v449_v37 }
  0xcc   : > { %493 = vst [vmem:[%s235_s24] sm:$0xff] %v491_v40 }
  0xce   : > { %v474_v43 = vpop.f32.mrf.mxu2  ;;  %v487_v45 = vpop.f32.mrf.mxu3 }
  0xcf   : > { %v475_v44 = vadd.f32 %v474_v43, %v273_v41  ;;  %v450_v46 = vpop.f32.mrf.mxu0  ;;  %v488_v47 = vadd.f32 %v487_v45, %v274_v42  ;;  %v463_v48 = vpop.f32.mrf.mxu1 }
  0xd1   : > { %v492_v49 = vpack.c.bf16 %v488_v47, %v475_v44 }
  0xd3   : > { %494 = vst [vmem:[%s235_s24 + $0x8] sm:$0xff] %v492_v49 }
  0xd4   : > { %996 = shalt.err (!%p993_p13)
}
  0xd5   : > { %804 = dma.vmem_to_hbm [thread:$0]  (%p1155_p0), %s512_s25, 256, %s514_s26, %s496_s15  }
  0xd6   : > { %v476_v50 = vpop.f32.mrf.mxu2  ;;  %v489_v51 = vpop.f32.mrf.mxu3 }
  0xd7 PF: > { %s525_s5 = sand.u32 1, %s1035_s12   ;;  %p818_p2 = pnand %p620_p6, %p1162_p5 }
  0xd8   : > { %s526_s9 = scalar_lea.sflag [#allocation4], %s525_s5 }
  0xd9   : > { %p819_p4 = pneg %p818_p2 }
  0xdb   : > { %1030 = dma.done.wait (%p819_p4), %s526_s9, 256  }
  0xdc   : > { %1032 = vsyncadd (%p819_p4), %s526_s9, 4294967040  ;;  %s20_s17 = sadd.s32 1, %s1055_s17   ;;  %s1238_s12 = smov %s1039_s13 }
  0xdd   : > { %p17_p7 = scmp.ge.s32.totalorder %s20_s17, 4   ;;  %s1239_s13 = smov %s1043_s14 }
  0xde   : > { %s1240_s14 = smov %s1160_s20  ;;  %s1241_s15 = smov %s1051_s16 }
  0xdf   : > { %s1242_s16 = smov %s1244_s6  ;;  %19 = sbr.rel (!%p17_p7) target bundleno = 7 (0x7), region = 85 }
  0xe4   :  { %532 = vsyncpa [#allocation3], 1 }
  0xe5   :  { %534 = vsyncpa [#allocation3 + $0x1], 1 }
  0xe6   :  { %535 = vsyncpa [#allocation6], 1 }
  0xe7   :  { %536 = vsyncpa [#allocation4], 1 }
  0xe8   :  { %538 = vsyncpa [#allocation4 + $0x1], 1 }

</bundles_post_ra>
